<compile_context>
chip_gen: v7x
topology: tpu7x:2x2x1
jax: 0.10.0
libtpu: 0.0.40
codegen_flags: <defaults>
</compile_context>

<pallas_src>
import functools

import jax
import jax.numpy as jnp
from jax.experimental import pallas as pl
from jax.experimental.pallas import tpu as pltpu

BN_EPS = 1e-5
LANES = 128
TARGET_ROWS = 2048          # activation rows per grid step (~6 MiB f32 temps)


def _round_up(x, m):
    return ((x + m - 1) // m) * m


def _vmem_limit(rows, cin):
    """Per-step VMEM footprint estimate (x tile double-buffered, resident
    weights, f32/bf16 activation temps, output blocks) with 2x headroom."""
    est = (2 * rows * cin * 4                 # x tile, double buffered
           + (cin + LANES) * LANES * 2        # bf16 W1p + W2p
           + 8 * LANES * 4                    # scale/shift vectors
           + 6 * rows * LANES * 4             # h1/a1/h2/a2 + bf16 casts
           + 4 * LANES * LANES * 4)           # output blocks / misc
    return int(min(max(2 * est, 4 * 1024 * 1024), 64 * 1024 * 1024))


# --------------------------------------------------------------------------
# Phase 2: per-tile partial sum / sum-of-squares of h2 = relu(bn1(x@W1)) @ W2
# over the flattened (B*N) row axis.  Each grid step owns its output block,
# so the grid axis is safely "parallel".
# --------------------------------------------------------------------------
def _stats2_kernel(x_ref, w1_ref, s1_ref, t1_ref, w2_ref, part_ref, *,
                   tile_r, rows_valid_last, mask_last):
    j = pl.program_id(0)
    h1 = jnp.dot(x_ref[...].astype(jnp.bfloat16), w1_ref[...],
                 preferred_element_type=jnp.float32)
    a1 = jnp.maximum(h1 * s1_ref[...] + t1_ref[...], 0.0)      # folded BN1+ReLU
    h2 = jnp.dot(a1.astype(jnp.bfloat16), w2_ref[...],
                 preferred_element_type=jnp.float32)

    part_ref[...] = jnp.concatenate(
        [jnp.sum(h2, axis=0, keepdims=True),
         jnp.sum(h2 * h2, axis=0, keepdims=True)], axis=0)

    if mask_last:
        # Zero-padded x rows still produce h2_pad = relu(shift1)@W2 != 0, so
        # only the boundary tile recomputes its partial with them masked out.
        @pl.when(j == pl.num_programs(0) - 1)
        def _():
            row = jax.lax.broadcasted_iota(jnp.int32, (tile_r, 1), 0)
            hm = jnp.where(row < rows_valid_last, h2, 0.0)
            part_ref[...] = jnp.concatenate(
                [jnp.sum(hm, axis=0, keepdims=True),
                 jnp.sum(hm * hm, axis=0, keepdims=True)], axis=0)


# --------------------------------------------------------------------------
# Phase 3: folded BN1/BN2 + ReLU and running per-batch max-pool.  Each grid
# step processes bb batches x tile_np points; padded rows are edge-replicated
# copies of real points, so no mask is needed before the max.
# --------------------------------------------------------------------------
def _apply_pool_kernel(x_ref, w1_ref, s1_ref, t1_ref, w2_ref, s2_ref, t2_ref,
                       o_ref, *, bb, tile_np):
    j = pl.program_id(1)
    cin = x_ref.shape[-1]
    x = x_ref[...].reshape(bb * tile_np, cin)
    h1 = jnp.dot(x.astype(jnp.bfloat16), w1_ref[...],
                 preferred_element_type=jnp.float32)
    a1 = jnp.maximum(h1 * s1_ref[...] + t1_ref[...], 0.0)
    h2 = jnp.dot(a1.astype(jnp.bfloat16), w2_ref[...],
                 preferred_element_type=jnp.float32)
    a2 = jnp.maximum(h2 * s2_ref[...] + t2_ref[...], 0.0)
    tile_max = jnp.max(a2.reshape(bb, tile_np, LANES), axis=1)   # (bb, 128)

    @pl.when(j == 0)
    def _():
        o_ref[...] = tile_max

    @pl.when(j > 0)
    def _():
        o_ref[...] = jnp.maximum(o_ref[...], tile_max)


# --------------------------------------------------------------------------
# Wrapper
# --------------------------------------------------------------------------
def prepare_params(params, input_dim, feature_dim):
    """One-time weight preprocessing: transpose, zero-pad channels to 128
    lanes, and pre-cast the MXU operands to bf16."""
    hidden = params["w1"].shape[0]
    f32, bf16 = jnp.float32, jnp.bfloat16

    def padvec(v):
        return jnp.zeros((1, LANES), f32).at[0, :v.shape[0]].set(v)

    w1p = jnp.zeros((input_dim, LANES), f32).at[:, :hidden].set(params["w1"].T)
    w2p = jnp.zeros((LANES, LANES), f32).at[:hidden, :feature_dim].set(params["w2"].T)
    # Conv1d biases b1/b2 cancel exactly under the batch-stat BatchNorms.
    return {
        "w1p_f32": w1p,                       # closed-form BN1 stats (f32)
        "w1p": w1p.astype(bf16),              # bf16 MXU operands
        "w2p": w2p.astype(bf16),
        "g1p": padvec(params["g1"]), "be1p": padvec(params["be1"]),
        "g2p": padvec(params["g2"]), "be2p": padvec(params["be2"]),
        "wfc_t": params["wfc"].T.astype(f32), # final fc runs as plain XLA matmul
        "bfc": params["bfc"].astype(f32),
    }


def _bn_scale_shift(stats, n, gamma, beta):
    """Fold batch-stat BN into one per-channel scale/shift FMA (f32)."""
    mean = stats[0:1, :] / n
    var = jnp.maximum(stats[1:2, :] / n - mean * mean, 0.0)
    scale = gamma * jax.lax.rsqrt(var + BN_EPS)
    shift = beta - mean * scale
    return scale, shift


@functools.partial(jax.jit, static_argnames=("feature_dim", "target_rows"))
def pointnetpp_forward(x, prep, feature_dim, target_rows=TARGET_ROWS):
    """x: (B, N, input_dim) float32 -> (B, feature_dim) float32."""
    B, N, Cin = x.shape
    R = B * N

    # ---- Phase 1 (closed form, no kernel): BN1 stats of h1 = x @ W1 -------
    xf = x.reshape(R, Cin)
    w1f = prep["w1p_f32"]
    sum1 = jnp.sum(xf, axis=0) @ w1f                     # (128,)
    gram = xf.T @ xf                                     # (Cin, Cin)
    sumsq1 = jnp.sum(w1f * (gram @ w1f), axis=0)         # (128,)
    stats1 = jnp.stack([sum1, sumsq1])                   # (2, 128)
    scale1, shift1 = _bn_scale_shift(stats1, R, prep["g1p"], prep["be1p"])

    # ---- Phase 2 (Pallas): BN2 batch statistics over flattened B*N rows ---
    tile_r = min(target_rows, _round_up(R, 8))
    rp = _round_up(R, tile_r)
    num_tiles = rp // tile_r
    x_rows = xf if rp == R else jnp.pad(xf, ((0, rp - R), (0, 0)))

    vec2 = pl.BlockSpec((1, LANES), lambda j: (0, 0))
    stats2_partials = pl.pallas_call(
        functools.partial(_stats2_kernel, tile_r=tile_r,
                          rows_valid_last=R - (num_tiles - 1) * tile_r,
                          mask_last=rp != R),
        grid=(num_tiles,),
        in_specs=[pl.BlockSpec((tile_r, Cin), lambda j: (j, 0)),
                  pl.BlockSpec((Cin, LANES), lambda j: (0, 0)),
                  vec2, vec2,
                  pl.BlockSpec((LANES, LANES), lambda j: (0, 0))],
        out_specs=pl.BlockSpec((None, 2, LANES), lambda j: (j, 0, 0)),
        out_shape=jax.ShapeDtypeStruct((num_tiles, 2, LANES), jnp.float32),
        compiler_params=pltpu.CompilerParams(
            dimension_semantics=("parallel",),
            vmem_limit_bytes=_vmem_limit(tile_r, Cin)),
    )(x_rows, prep["w1p"], scale1, shift1, prep["w2p"])
    stats2 = jnp.sum(stats2_partials, axis=0)
    scale2, shift2 = _bn_scale_shift(stats2, R, prep["g2p"], prep["be2p"])

    # ---- Phase 3 (Pallas): folded BNs + ReLU + per-batch max pool ---------
    np8 = _round_up(N, 8)
    if np8 <= target_rows:
        tile_np, bb = np8, max(1, target_rows // np8)
    else:
        tile_np, bb = target_rows, 1
    if bb >= B:
        bb = B                                 # one block covers the batch axis
    else:
        bb = max(8, (bb // 8) * 8)             # keep the (bb,128) output block tiled
    n_pad = _round_up(N, tile_np)
    b_pad = _round_up(B, bb)
    x3 = x
    if n_pad != N or b_pad != B:
        # Edge replication: duplicated points/batches can never change the max.
        x3 = jnp.pad(x, ((0, b_pad - B), (0, n_pad - N), (0, 0)), mode="edge")

    grid3 = (b_pad // bb, n_pad // tile_np)
    wmat = pl.BlockSpec((LANES, LANES), lambda i, j: (0, 0))
    vec3 = pl.BlockSpec((1, LANES), lambda i, j: (0, 0))
    pooled = pl.pallas_call(
        functools.partial(_apply_pool_kernel, bb=bb, tile_np=tile_np),
        grid=grid3,
        in_specs=[pl.BlockSpec((bb, tile_np, Cin), lambda i, j: (i, j, 0)),
                  pl.BlockSpec((Cin, LANES), lambda i, j: (0, 0)),
                  vec3, vec3, wmat, vec3, vec3],
        out_specs=pl.BlockSpec((bb, LANES), lambda i, j: (i, 0)),
        out_shape=jax.ShapeDtypeStruct((b_pad, LANES), jnp.float32),
        compiler_params=pltpu.CompilerParams(
            dimension_semantics=("parallel", "arbitrary"),
            vmem_limit_bytes=_vmem_limit(bb * tile_np, Cin)),
    )(x3, prep["w1p"], scale1, shift1, prep["w2p"], scale2, shift2)

    # ---- Final fc: one well-shaped XLA matmul on the pooled features ------
    pooled = pooled[:B, :feature_dim]
    return pooled @ prep["wfc_t"] + prep["bfc"]


# --------------------------------------------------------------------------
# Pure-JAX reference (same training-mode BN math as torch on a fresh module)
# --------------------------------------------------------------------------
def pointnetpp_reference(x, params):
    B, N, Cin = x.shape
    h = x.reshape(B * N, Cin)

    def block(h, w, b, g, be):
        h = h @ w.T + b
        mu = jnp.mean(h, axis=0, keepdims=True)
        var = jnp.mean((h - mu) ** 2, axis=0, keepdims=True)
        h = g * (h - mu) / jnp.sqrt(var + BN_EPS) + be
        return jnp.maximum(h, 0.0)

    h = block(h, params["w1"], params["b1"], params["g1"], params["be1"])
    h = block(h, params["w2"], params["b2"], params["g2"], params["be2"])
    pooled = jnp.max(h.reshape(B, N, -1), axis=1)
    return pooled @ params["wfc"].T + params["bfc"]


def init_params(key, input_dim, feature_dim, hidden=64):
    ks = jax.random.split(key, 6)
    f32 = jnp.float32
    return {
        # Conv1d(input_dim, 64, 1): weight (64, input_dim, 1) -> squeeze kernel dim
        "w1": 0.1 * jax.random.normal(ks[0], (hidden, input_dim), f32),
        "b1": 0.1 * jax.random.normal(ks[1], (hidden,), f32),
        "g1": jnp.ones((hidden,), f32),          # BatchNorm1d default init
        "be1": jnp.zeros((hidden,), f32),
        # Conv1d(64, feature_dim, 1)
        "w2": 0.1 * jax.random.normal(ks[2], (feature_dim, hidden), f32),
        "b2": 0.1 * jax.random.normal(ks[3], (feature_dim,), f32),
        "g2": jnp.ones((feature_dim,), f32),
        "be2": jnp.zeros((feature_dim,), f32),
        # Linear(feature_dim, feature_dim)
        "wfc": 0.1 * jax.random.normal(ks[4], (feature_dim, feature_dim), f32),
        "bfc": 0.1 * jax.random.normal(ks[5], (feature_dim,), f32),
    }
    # TODO(synk): BatchNorm running-stat updates (training-time side effect) are
    # not modeled; they do not affect the forward output.


if __name__ == "__main__":
    B, N, input_dim, feature_dim = 2, 16, 4, 32

    key = jax.random.PRNGKey(0)
    k_x, k_p = jax.random.split(key)
    x = jax.random.normal(k_x, (B, N, input_dim), jnp.float32)
    params = init_params(k_p, input_dim, feature_dim)
    prep = prepare_params(params, input_dim, feature_dim)   # one-time preprocessing

    out = jax.block_until_ready(pointnetpp_forward(x, prep, feature_dim=feature_dim))
    ref = jax.block_until_ready(pointnetpp_reference(x, params))

    assert out.shape == (B, feature_dim), out.shape
    # Tolerance relaxed vs. the pure-f32 version: matmul operands are bf16
    # (MXU-native); elementwise/stat math stays f32.
    assert jnp.allclose(out, ref, atol=5e-2, rtol=5e-2), (out, ref)
    print("KERNEL_OK")
</pallas_src>

<mosaic_0001>
module attributes {stable_mosaic.version = 11 : i64} {
  func.func @_stats2_kernel(%arg0: i32, %arg1: memref<32x4xf32, #tpu.memory_space<vmem>>, %arg2: memref<4x128xbf16, #tpu.memory_space<vmem>>, %arg3: memref<1x128xf32, #tpu.memory_space<vmem>>, %arg4: memref<1x128xf32, #tpu.memory_space<vmem>>, %arg5: memref<128x128xbf16, #tpu.memory_space<vmem>>, %arg6: memref<1x2x128xf32, #tpu.memory_space<vmem>>) attributes {dimension_semantics = [#tpu.dimension_semantics<parallel>], iteration_bounds = array<i64: 1>, scalar_prefetch = 0 : i64, scratch_operands = 0 : i64, tpu.core_type = #tpu.core_type<tc>, window_params = [{transform_indices = @transform_0, window_bounds = array<i64: 32, 4>}, {pipeline_mode = #tpu.pipeline_mode<synchronous>, transform_indices = @transform_1, window_bounds = array<i64: 4, 128>}, {pipeline_mode = #tpu.pipeline_mode<synchronous>, transform_indices = @transform_2, window_bounds = array<i64: 1, 128>}, {pipeline_mode = #tpu.pipeline_mode<synchronous>, transform_indices = @transform_3, window_bounds = array<i64: 1, 128>}, {pipeline_mode = #tpu.pipeline_mode<synchronous>, transform_indices = @transform_4, window_bounds = array<i64: 128, 128>}, {transform_indices = @transform_5, window_bounds = array<i64: 1, 2, 128>}]} {
    %c0 = arith.constant 0 : index
    %c0_0 = arith.constant 0 : index
    %0 = vector.load %arg1[%c0, %c0_0] : memref<32x4xf32, #tpu.memory_space<vmem>>, vector<32x4xf32>
    %1 = arith.truncf %0 : vector<32x4xf32> to vector<32x4xbf16>
    %c0_1 = arith.constant 0 : index
    %c0_2 = arith.constant 0 : index
    %2 = vector.load %arg2[%c0_1, %c0_2] : memref<4x128xbf16, #tpu.memory_space<vmem>>, vector<4x128xbf16>
    %cst = arith.constant dense<0.000000e+00> : vector<32x128xf32>
    %3 = tpu.matmul %1, %2, %cst {dimension_numbers = #tpu.dot_dimension_numbers<[1], [0], [0], [1], [0, 0, 1, 1], [], []>} : vector<32x4xbf16>, vector<4x128xbf16>, vector<32x128xf32> -> vector<32x128xf32>
    %c0_3 = arith.constant 0 : index
    %c0_4 = arith.constant 0 : index
    %4 = vector.load %arg3[%c0_3, %c0_4] : memref<1x128xf32, #tpu.memory_space<vmem>>, vector<1x128xf32>
    %5 = vector.broadcast %4 : vector<1x128xf32> to vector<32x128xf32>
    %6 = arith.mulf %3, %5 : vector<32x128xf32>
    %c0_5 = arith.constant 0 : index
    %c0_6 = arith.constant 0 : index
    %7 = vector.load %arg4[%c0_5, %c0_6] : memref<1x128xf32, #tpu.memory_space<vmem>>, vector<1x128xf32>
    %8 = vector.broadcast %7 : vector<1x128xf32> to vector<32x128xf32>
    %9 = arith.addf %6, %8 : vector<32x128xf32>
    %cst_7 = arith.constant 0.000000e+00 : f32
    %10 = vector.broadcast %cst_7 : f32 to vector<32x128xf32>
    %11 = arith.maximumf %9, %10 : vector<32x128xf32>
    %12 = arith.truncf %11 : vector<32x128xf32> to vector<32x128xbf16>
    %c0_8 = arith.constant 0 : index
    %c0_9 = arith.constant 0 : index
    %13 = vector.load %arg5[%c0_8, %c0_9] : memref<128x128xbf16, #tpu.memory_space<vmem>>, vector<128x128xbf16>
    %cst_10 = arith.constant dense<0.000000e+00> : vector<32x128xf32>
    %14 = tpu.matmul %12, %13, %cst_10 {dimension_numbers = #tpu.dot_dimension_numbers<[1], [0], [0], [1], [0, 0, 1, 1], [], []>} : vector<32x128xbf16>, vector<128x128xbf16>, vector<32x128xf32> -> vector<32x128xf32>
    %cst_11 = arith.constant dense<0.000000e+00> : vector<128xf32>
    %15 = vector.multi_reduction <add>, %14, %cst_11 [0] : vector<32x128xf32> to vector<128xf32>
    %16 = vector.shape_cast %15 : vector<128xf32> to vector<1x128xf32>
    %17 = arith.mulf %14, %14 : vector<32x128xf32>
    %cst_12 = arith.constant dense<0.000000e+00> : vector<128xf32>
    %18 = vector.multi_reduction <add>, %17, %cst_12 [0] : vector<32x128xf32> to vector<128xf32>
    %19 = vector.shape_cast %18 : vector<128xf32> to vector<1x128xf32>
    %20 = tpu.concatenate %16, %19 in 0 : vector<1x128xf32>, vector<1x128xf32> -> vector<2x128xf32>
    %c0_13 = arith.constant 0 : index
    %c0_14 = arith.constant 0 : index
    %c0_15 = arith.constant 0 : index
    %21 = vector.load %arg6[%c0_13, %c0_14, %c0_15] : memref<1x2x128xf32, #tpu.memory_space<vmem>>, vector<1x2x128xf32>
    %22 = vector.shape_cast %21 : vector<1x2x128xf32> to vector<2x128xf32>
    %23 = vector.shape_cast %20 : vector<2x128xf32> to vector<1x2x128xf32>
    tpu.vector_store %arg6[%c0_13, %c0_14, %c0_15], %23 {strides = array<i32>} : memref<1x2x128xf32, #tpu.memory_space<vmem>>, vector<1x2x128xf32>,
    return
  }
  func.func @transform_0(%arg0: i32) -> (i32, i32) {
    %c0_i32 = arith.constant 0 : i32
    %c0_i32_0 = arith.constant 0 : i32
    return %arg0, %c0_i32 : i32, i32
  }
  func.func @transform_1(%arg0: i32) -> (i32, i32) {
    %c0_i32 = arith.constant 0 : i32
    %c0_i32_0 = arith.constant 0 : i32
    %c0_i32_1 = arith.constant 0 : i32
    return %c0_i32, %c0_i32_0 : i32, i32
  }
  func.func @transform_2(%arg0: i32) -> (i32, i32) {
    %c0_i32 = arith.constant 0 : i32
    %c0_i32_0 = arith.constant 0 : i32
    %c0_i32_1 = arith.constant 0 : i32
    return %c0_i32, %c0_i32_0 : i32, i32
  }
  func.func @transform_3(%arg0: i32) -> (i32, i32) {
    %c0_i32 = arith.constant 0 : i32
    %c0_i32_0 = arith.constant 0 : i32
    %c0_i32_1 = arith.constant 0 : i32
    return %c0_i32, %c0_i32_0 : i32, i32
  }
  func.func @transform_4(%arg0: i32) -> (i32, i32) {
    %c0_i32 = arith.constant 0 : i32
    %c0_i32_0 = arith.constant 0 : i32
    %c0_i32_1 = arith.constant 0 : i32
    return %c0_i32, %c0_i32_0 : i32, i32
  }
  func.func @transform_5(%arg0: i32) -> (i32, i32, i32) {
    %c0_i32 = arith.constant 0 : i32
    %c0_i32_0 = arith.constant 0 : i32
    %c0_i32_1 = arith.constant 0 : i32
    return %arg0, %c0_i32, %c0_i32_0 : i32, i32, i32
  }
}

module attributes {stable_mosaic.version = 11 : i64} {
  func.func @_apply_pool_kernel(%arg0: i32, %arg1: i32, %arg2: memref<2x16x4xf32, #tpu.memory_space<vmem>>, %arg3: memref<4x128xbf16, #tpu.memory_space<vmem>>, %arg4: memref<1x128xf32, #tpu.memory_space<vmem>>, %arg5: memref<1x128xf32, #tpu.memory_space<vmem>>, %arg6: memref<128x128xbf16, #tpu.memory_space<vmem>>, %arg7: memref<1x128xf32, #tpu.memory_space<vmem>>, %arg8: memref<1x128xf32, #tpu.memory_space<vmem>>, %arg9: memref<2x128xf32, #tpu.memory_space<vmem>>) attributes {dimension_semantics = [#tpu.dimension_semantics<parallel>, #tpu.dimension_semantics<arbitrary>], iteration_bounds = array<i64: 1, 1>, scalar_prefetch = 0 : i64, scratch_operands = 0 : i64, tpu.core_type = #tpu.core_type<tc>, window_params = [{transform_indices = @transform_0, window_bounds = array<i64: 2, 16, 4>}, {pipeline_mode = #tpu.pipeline_mode<synchronous>, transform_indices = @transform_1, window_bounds = array<i64: 4, 128>}, {pipeline_mode = #tpu.pipeline_mode<synchronous>, transform_indices = @transform_2, window_bounds = array<i64: 1, 128>}, {pipeline_mode = #tpu.pipeline_mode<synchronous>, transform_indices = @transform_3, window_bounds = array<i64: 1, 128>}, {pipeline_mode = #tpu.pipeline_mode<synchronous>, transform_indices = @transform_4, window_bounds = array<i64: 128, 128>}, {pipeline_mode = #tpu.pipeline_mode<synchronous>, transform_indices = @transform_5, window_bounds = array<i64: 1, 128>}, {pipeline_mode = #tpu.pipeline_mode<synchronous>, transform_indices = @transform_6, window_bounds = array<i64: 1, 128>}, {transform_indices = @transform_7, window_bounds = array<i64: 2, 128>}]} {
    %c0 = arith.constant 0 : index
    %c0_0 = arith.constant 0 : index
    %c0_1 = arith.constant 0 : index
    %0 = vector.load %arg2[%c0, %c0_0, %c0_1] : memref<2x16x4xf32, #tpu.memory_space<vmem>>, vector<2x16x4xf32>
    %1 = vector.shape_cast %0 : vector<2x16x4xf32> to vector<32x4xf32>
    %2 = arith.truncf %1 : vector<32x4xf32> to vector<32x4xbf16>
    %c0_2 = arith.constant 0 : index
    %c0_3 = arith.constant 0 : index
    %3 = vector.load %arg3[%c0_2, %c0_3] : memref<4x128xbf16, #tpu.memory_space<vmem>>, vector<4x128xbf16>
    %cst = arith.constant dense<0.000000e+00> : vector<32x128xf32>
    %4 = tpu.matmul %2, %3, %cst {dimension_numbers = #tpu.dot_dimension_numbers<[1], [0], [0], [1], [0, 0, 1, 1], [], []>} : vector<32x4xbf16>, vector<4x128xbf16>, vector<32x128xf32> -> vector<32x128xf32>
    %c0_4 = arith.constant 0 : index
    %c0_5 = arith.constant 0 : index
    %5 = vector.load %arg4[%c0_4, %c0_5] : memref<1x128xf32, #tpu.memory_space<vmem>>, vector<1x128xf32>
    %6 = vector.broadcast %5 : vector<1x128xf32> to vector<32x128xf32>
    %7 = arith.mulf %4, %6 : vector<32x128xf32>
    %c0_6 = arith.constant 0 : index
    %c0_7 = arith.constant 0 : index
    %8 = vector.load %arg5[%c0_6, %c0_7] : memref<1x128xf32, #tpu.memory_space<vmem>>, vector<1x128xf32>
    %9 = vector.broadcast %8 : vector<1x128xf32> to vector<32x128xf32>
    %10 = arith.addf %7, %9 : vector<32x128xf32>
    %cst_8 = arith.constant 0.000000e+00 : f32
    %11 = vector.broadcast %cst_8 : f32 to vector<32x128xf32>
    %12 = arith.maximumf %10, %11 : vector<32x128xf32>
    %13 = arith.truncf %12 : vector<32x128xf32> to vector<32x128xbf16>
    %c0_9 = arith.constant 0 : index
    %c0_10 = arith.constant 0 : index
    %14 = vector.load %arg6[%c0_9, %c0_10] : memref<128x128xbf16, #tpu.memory_space<vmem>>, vector<128x128xbf16>
    %cst_11 = arith.constant dense<0.000000e+00> : vector<32x128xf32>
    %15 = tpu.matmul %13, %14, %cst_11 {dimension_numbers = #tpu.dot_dimension_numbers<[1], [0], [0], [1], [0, 0, 1, 1], [], []>} : vector<32x128xbf16>, vector<128x128xbf16>, vector<32x128xf32> -> vector<32x128xf32>
    %c0_12 = arith.constant 0 : index
    %c0_13 = arith.constant 0 : index
    %16 = vector.load %arg7[%c0_12, %c0_13] : memref<1x128xf32, #tpu.memory_space<vmem>>, vector<1x128xf32>
    %17 = vector.broadcast %16 : vector<1x128xf32> to vector<32x128xf32>
    %18 = arith.mulf %15, %17 : vector<32x128xf32>
    %c0_14 = arith.constant 0 : index
    %c0_15 = arith.constant 0 : index
    %19 = vector.load %arg8[%c0_14, %c0_15] : memref<1x128xf32, #tpu.memory_space<vmem>>, vector<1x128xf32>
    %20 = vector.broadcast %19 : vector<1x128xf32> to vector<32x128xf32>
    %21 = arith.addf %18, %20 : vector<32x128xf32>
    %cst_16 = arith.constant 0.000000e+00 : f32
    %22 = vector.broadcast %cst_16 : f32 to vector<32x128xf32>
    %23 = arith.maximumf %21, %22 : vector<32x128xf32>
    %24 = vector.shape_cast %23 : vector<32x128xf32> to vector<2x16x128xf32>
    %cst_17 = arith.constant dense<0xFF800000> : vector<2x128xf32>
    %25 = vector.multi_reduction <maximumf>, %24, %cst_17 [1] : vector<2x16x128xf32> to vector<2x128xf32>
    %c0_i32 = arith.constant 0 : i32
    %26 = arith.cmpi eq, %arg1, %c0_i32 : i32
    %27 = arith.extui %26 : i1 to i32
    %c0_i32_18 = arith.constant 0 : i32
    %28 = arith.cmpi ne, %27, %c0_i32_18 : i32
    scf.if %28 {
      %c0_21 = arith.constant 0 : index
      %c0_22 = arith.constant 0 : index
      %32 = vector.load %arg9[%c0_21, %c0_22] : memref<2x128xf32, #tpu.memory_space<vmem>>, vector<2x128xf32>
      tpu.vector_store %arg9[%c0_21, %c0_22], %25 {strides = array<i32>} : memref<2x128xf32, #tpu.memory_space<vmem>>, vector<2x128xf32>,
    } else {
    }
    %c0_i32_19 = arith.constant 0 : i32
    %29 = arith.cmpi sgt, %arg1, %c0_i32_19 : i32
    %30 = arith.extui %29 : i1 to i32
    %c0_i32_20 = arith.constant 0 : i32
    %31 = arith.cmpi ne, %30, %c0_i32_20 : i32
    scf.if %31 {
      %c0_21 = arith.constant 0 : index
      %c0_22 = arith.constant 0 : index
      %32 = vector.load %arg9[%c0_21, %c0_22] : memref<2x128xf32, #tpu.memory_space<vmem>>, vector<2x128xf32>
      %33 = arith.maximumf %32, %25 : vector<2x128xf32>
      %c0_23 = arith.constant 0 : index
      %c0_24 = arith.constant 0 : index
      %34 = vector.load %arg9[%c0_23, %c0_24] : memref<2x128xf32, #tpu.memory_space<vmem>>, vector<2x128xf32>
      tpu.vector_store %arg9[%c0_23, %c0_24], %33 {strides = array<i32>} : memref<2x128xf32, #tpu.memory_space<vmem>>, vector<2x128xf32>,
    } else {
    }
    return
  }
  func.func @transform_0(%arg0: i32, %arg1: i32) -> (i32, i32, i32) {
    %c0_i32 = arith.constant 0 : i32
    %c0_i32_0 = arith.constant 0 : i32
    return %arg0, %arg1, %c0_i32 : i32, i32, i32
  }
  func.func @transform_1(%arg0: i32, %arg1: i32) -> (i32, i32) {
    %c0_i32 = arith.constant 0 : i32
    %c0_i32_0 = arith.constant 0 : i32
    %c0_i32_1 = arith.constant 0 : i32
    return %c0_i32, %c0_i32_0 : i32, i32
  }
  func.func @transform_2(%arg0: i32, %arg1: i32) -> (i32, i32) {
    %c0_i32 = arith.constant 0 : i32
    %c0_i32_0 = arith.constant 0 : i32
    %c0_i32_1 = arith.constant 0 : i32
    return %c0_i32, %c0_i32_0 : i32, i32
  }
  func.func @transform_3(%arg0: i32, %arg1: i32) -> (i32, i32) {
    %c0_i32 = arith.constant 0 : i32
    %c0_i32_0 = arith.constant 0 : i32
    %c0_i32_1 = arith.constant 0 : i32
    return %c0_i32, %c0_i32_0 : i32, i32
  }
  func.func @transform_4(%arg0: i32, %arg1: i32) -> (i32, i32) {
    %c0_i32 = arith.constant 0 : i32
    %c0_i32_0 = arith.constant 0 : i32
    %c0_i32_1 = arith.constant 0 : i32
    return %c0_i32, %c0_i32_0 : i32, i32
  }
  func.func @transform_5(%arg0: i32, %arg1: i32) -> (i32, i32) {
    %c0_i32 = arith.constant 0 : i32
    %c0_i32_0 = arith.constant 0 : i32
    %c0_i32_1 = arith.constant 0 : i32
    return %c0_i32, %c0_i32_0 : i32, i32
  }
  func.func @transform_6(%arg0: i32, %arg1: i32) -> (i32, i32) {
    %c0_i32 = arith.constant 0 : i32
    %c0_i32_0 = arith.constant 0 : i32
    %c0_i32_1 = arith.constant 0 : i32
    return %c0_i32, %c0_i32_0 : i32, i32
  }
  func.func @transform_7(%arg0: i32, %arg1: i32) -> (i32, i32) {
    %c0_i32 = arith.constant 0 : i32
    %c0_i32_0 = arith.constant 0 : i32
    return %arg0, %c0_i32 : i32, i32
  }
}

</mosaic_0001>

<bundles_post_ra>
// kernel: pointnetpp_forward.2
= control target key start
LH: loop header
LB: loop body
LE: loop exit
PB: predicated region body
PF: predicated region fallthrough
CT: control target
= control target key end

     0   :  { %vm35_vm0 = vcmask 1041408   ;;  %vm28_vm1 = vcmask 31744   ;;  %vm251_vm2 = vcmask 1040384   ;;  %s396_s1 = inlined_call_operand.vmem [shape: bf16[4,128], index: 1, kind: input, shape index: {}]   ;;  %s397_s0 = inlined_call_operand.vmem [shape: f32[32,4], index: 0, kind: input, shape index: {}]   ;;  %s398_s4 = inlined_call_operand.vmem [shape: bf16[128,128], index: 4, kind: input, shape index: {}]   ;;  %s399_s2 = inlined_call_operand.vmem [shape: f32[1,128], index: 2, kind: input, shape index: {}]   ;;  %s400_s3 = inlined_call_operand.vmem [shape: f32[1,128], index: 3, kind: input, shape index: {}]   ;;  %s401_s5 = inlined_call_operand.vmem [shape: f32[1,2,128], index: 5, kind: output, shape index: {}]  }
   0x1   :  { %v27_v0 = vld [vmem:[%s396_s1] sm:$0x3]  ;;  %v22_v2 = vld [vmem:[%s397_s0 + $0x8] sm:$0xff]  ;;  %v23_v5 = vld [vmem:[%s397_s0 + $0x10] sm:$0xff] }
   0x2   :  { %v21_v1 = vld [vmem:[%s397_s0] sm:$0xff]  ;;  %309 = vmatprep.subr.msk.bf16.mxu0 %vm35_vm0, %v27_v0  ;;  %v37_v3 = vsel %vm35_vm0, %v27_v0, 0  ;;  %v24_v6 = vld [vmem:[%s397_s0 + $0x18] sm:$0xff]  ;;  %v311_v9 = vld [vmem:[%s398_s4 + $0x8] sm:$0xff]  }
   0x3   :  { %v25_v4 = vpack.c.bf16 %v22_v2, %v21_v1  ;;  %284 = vmatpush3.bf16.msra.mxu0 %v37_v3  ;;  %v26_v7 = vpack.c.bf16 %v24_v6, %v23_v5  ;;  %v310_v8 = vld [vmem:[%s398_s4] sm:$0xff]   ;;  %v312_v10 = vld [vmem:[%s398_s4 + $0x10] sm:$0xff]   ;;  %v313_v11 = vld [vmem:[%s398_s4 + $0x18] sm:$0xff]  }
   0x4   :  { %289 = vmatprep.subr.bf16.mxu1 %v310_v8  ;;  %v314_v12 = vld [vmem:[%s398_s4 + $0x20] sm:$0xff]   ;;  %v315_v13 = vld [vmem:[%s398_s4 + $0x28] sm:$0xff]   ;;  %v316_v14 = vld [vmem:[%s398_s4 + $0x30] sm:$0xff]  }
   0x5   :  { %285 = vmatprep.mubr.msk.bf16.mxu0 %vm28_vm1, %v25_v4  ;;  %290 = vmatpush3.bf16.msra.mxu1 %v310_v8  ;;  %v317_v15 = vld [vmem:[%s398_s4 + $0x38] sm:$0xff]   ;;  %v260_v16 = vld [vmem:[%s399_s2] ss:$0 sm:$0xff] }
   0x6   :  { %286 = vmatmul.mubr.msk.bf16.vlgmr.msra.gmra.mrb[0].mxu0 %vm28_vm1, %v26_v7  ;;  %291 = vmatprep.subr.bf16.mxu1 %v311_v9  ;;  %v261_v18 = vld [vmem:[%s400_s3] ss:$0 sm:$0xff] }
   0x9   :  { %292 = vmatpush3.bf16.msra.mxu1 %v311_v9 }
   0xa   :  { %293 = vmatprep.subr.bf16.mxu1 %v312_v10 }
   0xd   :  { %294 = vmatpush3.bf16.msra.mxu1 %v312_v10 }
   0xe   :  { %295 = vmatprep.subr.bf16.mxu1 %v313_v11 }
  0x11   :  { %296 = vmatpush3.bf16.msra.mxu1 %v313_v11 }
  0x12   :  { %297 = vmatprep.subr.bf16.mxu1 %v314_v12 }
  0x15   :  { %298 = vmatpush3.bf16.msra.mxu1 %v314_v12 }
  0x16   :  { %299 = vmatprep.subr.bf16.mxu1 %v315_v13 }
  0x19   :  { %300 = vmatpush3.bf16.msra.mxu1 %v315_v13 }
  0x1a   :  { %301 = vmatprep.subr.bf16.mxu1 %v316_v14 }
  0x1d   :  { %302 = vmatpush3.bf16.msra.mxu1 %v316_v14 }
  0x1e   :  { %303 = vmatprep.subr.bf16.mxu1 %v317_v15 }
  0x21   :  { %304 = vmatpush3.bf16.msra.mxu1 %v317_v15 }
  0xd9   :  { %v287_v17 = vpop.f32.mrb[0].mxu0 }
  0xda   :  { %v97_v19 = vmul.f32 %v287_v17, %v260_v16  ;;  %v73_v20 = vpop.f32.mrb[1].mxu0 }
  0xdb   :  { %v95_v21 = vmul.f32 %v260_v16, %v73_v20  ;;  %v288_v22 = vpop.f32.mrb[2].mxu0 }
  0xdc   :  { %v108_v23 = vadd.f32 %v261_v18, %v97_v19  ;;  %v98_v24 = vmul.f32 %v288_v22, %v260_v16  ;;  %v76_v25 = vpop.f32.mrb[3].mxu0 }
  0xdd   :  { %v96_v26 = vmul.f32 %v260_v16, %v76_v25  ;;  %v106_v27 = vadd.f32 %v261_v18, %v95_v21 }
  0xde   :  { %v109_v28 = vadd.f32 %v261_v18, %v98_v24  ;;  %v112_v30 = vmax.f32 %v108_v23, 0.0 }
  0xdf   :  { %v107_v29 = vadd.f32 %v261_v18, %v96_v26  ;;  %v110_v32 = vmax.f32 %v106_v27, 0.0 }
  0xe0   :  { %v113_v31 = vmax.f32 %v109_v28, 0.0 }
  0xe1   :  { %v111_v33 = vmax.f32 %v107_v29, 0.0 }
  0xe2   :  { %v115_v34 = vpack.c.bf16 %v113_v31, %v112_v30 }
  0xe3   :  { %v114_v35 = vpack.c.bf16 %v111_v33, %v110_v32 }
  0xe5   :  { %305 = vmatprep.mubr.bf16.mxu1 %v114_v35 }
  0xe6   :  { %306 = vmatmul.mubr.bf16.vlgmr.msra.gmra.mrb[0].mxu1 %v115_v34 }
 0x1b9   :  { %v307_v36 = vpop.f32.mrb[0].mxu1 }
 0x1ba   :  { %v214_v37 = vpop.f32.mrb[1].mxu1  ;;  %v240_v43 = vmul.f32 %v307_v36, %v307_v36 }
 0x1bb   :  { %v308_v38 = vpop.f32.mrb[2].mxu1  ;;  %v238_v40 = vmul.f32 %v214_v37, %v214_v37 }
 0x1bc   :  { %v217_v39 = vpop.f32.mrb[3].mxu1  ;;  %v241_v46 = vmul.f32 %v308_v38, %v308_v38 }
 0x1bd   :  { %v229_v41 = vadd.f32 %v217_v39, %v214_v37  ;;  %v239_v42 = vmul.f32 %v217_v39, %v217_v39 }
 0x1bf   :  { %v230_v44 = vadd.f32 %v307_v36, %v229_v41  ;;  %v242_v45 = vadd.f32 %v239_v42, %v238_v40 }
 0x1c1   :  { %v231_v47 = vadd.f32 %v308_v38, %v230_v44  ;;  %v243_v48 = vadd.f32 %v242_v45, %v240_v43 }
 0x1c3   :  { %v232_v49 = vrot.slane %v231_v47, 4  ;;  %v244_v50 = vadd.f32 %v243_v48, %v241_v46 }
 0x1c5   :  { %v233_v51 = vadd.f32 %v232_v49, %v231_v47  ;;  %v245_v52 = vrot.slane %v244_v50, 4 }
 0x1c7   :  { %v234_v53 = vrot.slane %v233_v51, 2  ;;  %v246_v54 = vadd.f32 %v245_v52, %v244_v50 }
 0x1c9   :  { %v235_v55 = vadd.f32 %v234_v53, %v233_v51  ;;  %v247_v56 = vrot.slane %v246_v54, 2 }
 0x1cb   :  { %v236_v57 = vrot.slane %v235_v55, 1  ;;  %v248_v58 = vadd.f32 %v247_v56, %v246_v54 }
 0x1cd   :  { %v249_v59 = vrot.slane %v248_v58, 1  ;;  %v237_v60 = vadd.f32 %v236_v57, %v235_v55 }
 0x1cf   :  { %v250_v61 = vadd.f32 %v249_v59, %v248_v58 }
 0x1d1   :  { %v252_v62 = vsel %vm251_vm2, %v237_v60, %v250_v61 }
 0x1d2   :  { %253 = vst [vmem:[%s401_s5] sm:$0x3] %v252_v62 }

// kernel: pointnetpp_forward.3
= control target key start
LH: loop header
LB: loop body
LE: loop exit
PB: predicated region body
PF: predicated region fallthrough
CT: control target
= control target key end

     0   :  { %vm41_vm0 = vcmask 1041408   ;;  %vm34_vm1 = vcmask 31744   ;;  %vm281_vm2 = vcmask 1041409   ;;  %s457_s1 = inlined_call_operand.vmem [shape: bf16[4,128], index: 1, kind: input, shape index: {}]   ;;  %s458_s0 = inlined_call_operand.vmem [shape: f32[2,16,4], index: 0, kind: input, shape index: {}]   ;;  %s459_s4 = inlined_call_operand.vmem [shape: bf16[128,128], index: 4, kind: input, shape index: {}]   ;;  %s460_s2 = inlined_call_operand.vmem [shape: f32[1,128], index: 2, kind: input, shape index: {}]   ;;  %s461_s3 = inlined_call_operand.vmem [shape: f32[1,128], index: 3, kind: input, shape index: {}]   ;;  %s462_s5 = inlined_call_operand.vmem [shape: f32[1,128], index: 5, kind: input, shape index: {}]   ;;  %s463_s6 = inlined_call_operand.vmem [shape: f32[1,128], index: 6, kind: input, shape index: {}]   ;;  %s464_s7 = inlined_call_operand.vmem [shape: f32[2,128], index: 7, kind: output, shape index: {}]  }
   0x1   :  { %v33_v0 = vld [vmem:[%s457_s1] sm:$0x3]  ;;  %v28_v2 = vld [vmem:[%s458_s0 + $0x8] sm:$0xff]  ;;  %v29_v5 = vld [vmem:[%s458_s0 + $0x10] sm:$0xff] }
   0x2   :  { %v27_v1 = vld [vmem:[%s458_s0] sm:$0xff]  ;;  %354 = vmatprep.subr.msk.bf16.mxu0 %vm41_vm0, %v33_v0  ;;  %v43_v3 = vsel %vm41_vm0, %v33_v0, 0  ;;  %v30_v6 = vld [vmem:[%s458_s0 + $0x18] sm:$0xff]  ;;  %v356_v9 = vld [vmem:[%s459_s4 + $0x8] sm:$0xff]  }
   0x3   :  { %v31_v4 = vpack.c.bf16 %v28_v2, %v27_v1  ;;  %329 = vmatpush3.bf16.msra.mxu0 %v43_v3  ;;  %v32_v7 = vpack.c.bf16 %v30_v6, %v29_v5  ;;  %v355_v8 = vld [vmem:[%s459_s4] sm:$0xff]   ;;  %v357_v10 = vld [vmem:[%s459_s4 + $0x10] sm:$0xff]   ;;  %v358_v11 = vld [vmem:[%s459_s4 + $0x18] sm:$0xff]  }
   0x4   :  { %334 = vmatprep.subr.bf16.mxu1 %v355_v8  ;;  %v359_v12 = vld [vmem:[%s459_s4 + $0x20] sm:$0xff]   ;;  %v360_v13 = vld [vmem:[%s459_s4 + $0x28] sm:$0xff]   ;;  %v361_v14 = vld [vmem:[%s459_s4 + $0x30] sm:$0xff]  }
   0x5   :  { %330 = vmatprep.mubr.msk.bf16.mxu0 %vm34_vm1, %v31_v4  ;;  %335 = vmatpush3.bf16.msra.mxu1 %v355_v8  ;;  %v362_v15 = vld [vmem:[%s459_s4 + $0x38] sm:$0xff]   ;;  %v303_v16 = vld [vmem:[%s460_s2] ss:$0 sm:$0xff] }
   0x6   :  { %331 = vmatmul.mubr.msk.bf16.vlgmr.msra.gmra.mrb[0].mxu0 %vm34_vm1, %v32_v7  ;;  %336 = vmatprep.subr.bf16.mxu1 %v356_v9  ;;  %v304_v18 = vld [vmem:[%s461_s3] ss:$0 sm:$0xff] }
   0x7   :  { %v313_v36 = vld [vmem:[%s462_s5] ss:$0 sm:$0xff] }
   0x8   :  { %v314_v38 = vld [vmem:[%s463_s6] ss:$0 sm:$0xff] }
   0x9   :  { %337 = vmatpush3.bf16.msra.mxu1 %v356_v9 }
   0xa   :  { %338 = vmatprep.subr.bf16.mxu1 %v357_v10 }
   0xd   :  { %339 = vmatpush3.bf16.msra.mxu1 %v357_v10 }
   0xe   :  { %340 = vmatprep.subr.bf16.mxu1 %v358_v11 }
  0x11   :  { %341 = vmatpush3.bf16.msra.mxu1 %v358_v11 }
  0x12   :  { %342 = vmatprep.subr.bf16.mxu1 %v359_v12 }
  0x15   :  { %343 = vmatpush3.bf16.msra.mxu1 %v359_v12 }
  0x16   :  { %344 = vmatprep.subr.bf16.mxu1 %v360_v13 }
  0x19   :  { %345 = vmatpush3.bf16.msra.mxu1 %v360_v13 }
  0x1a   :  { %346 = vmatprep.subr.bf16.mxu1 %v361_v14 }
  0x1d   :  { %347 = vmatpush3.bf16.msra.mxu1 %v361_v14 }
  0x1e   :  { %348 = vmatprep.subr.bf16.mxu1 %v362_v15 }
  0x21   :  { %349 = vmatpush3.bf16.msra.mxu1 %v362_v15 }
  0xd9   :  { %v332_v17 = vpop.f32.mrb[0].mxu0 }
  0xda   :  { %v103_v19 = vmul.f32 %v332_v17, %v303_v16  ;;  %v79_v20 = vpop.f32.mrb[1].mxu0 }
  0xdb   :  { %v101_v21 = vmul.f32 %v303_v16, %v79_v20  ;;  %v333_v22 = vpop.f32.mrb[2].mxu0 }
  0xdc   :  { %v114_v23 = vadd.f32 %v304_v18, %v103_v19  ;;  %v104_v24 = vmul.f32 %v333_v22, %v303_v16  ;;  %v82_v25 = vpop.f32.mrb[3].mxu0 }
  0xdd   :  { %v102_v26 = vmul.f32 %v303_v16, %v82_v25  ;;  %v112_v27 = vadd.f32 %v304_v18, %v101_v21 }
  0xde   :  { %v115_v28 = vadd.f32 %v304_v18, %v104_v24  ;;  %v118_v30 = vmax.f32 %v114_v23, 0.0 }
  0xdf   :  { %v113_v29 = vadd.f32 %v304_v18, %v102_v26  ;;  %v116_v32 = vmax.f32 %v112_v27, 0.0 }
  0xe0   :  { %v119_v31 = vmax.f32 %v115_v28, 0.0 }
  0xe1   :  { %v117_v33 = vmax.f32 %v113_v29, 0.0 }
  0xe2   :  { %v121_v34 = vpack.c.bf16 %v119_v31, %v118_v30 }
  0xe3   :  { %v120_v35 = vpack.c.bf16 %v117_v33, %v116_v32 }
  0xe5   :  { %350 = vmatprep.mubr.bf16.mxu1 %v120_v35 }
  0xe6   :  { %351 = vmatmul.mubr.bf16.vlgmr.msra.gmra.mrb[0].mxu1 %v121_v34 }
 0x1b9   :  { %v352_v37 = vpop.f32.mrb[0].mxu1 }
 0x1ba   :  { %v244_v39 = vmul.f32 %v352_v37, %v313_v36  ;;  %v220_v40 = vpop.f32.mrb[1].mxu1 }
 0x1bb   :  { %v242_v41 = vmul.f32 %v313_v36, %v220_v40  ;;  %v353_v42 = vpop.f32.mrb[2].mxu1 }
 0x1bc   :  { %v255_v43 = vadd.f32 %v314_v38, %v244_v39  ;;  %v245_v44 = vmul.f32 %v353_v42, %v313_v36  ;;  %v223_v45 = vpop.f32.mrb[3].mxu1 }
 0x1bd   :  { %v253_v46 = vadd.f32 %v314_v38, %v242_v41  ;;  %v243_v47 = vmul.f32 %v313_v36, %v223_v45 }
 0x1be   :  { %v256_v48 = vadd.f32 %v314_v38, %v245_v44  ;;  %v259_v50 = vmax.f32 %v255_v43, 0.0 }
 0x1bf   :  { %v254_v49 = vadd.f32 %v314_v38, %v243_v47  ;;  %v257_v52 = vmax.f32 %v253_v46, 0.0 }
 0x1c0   :  { %v260_v51 = vmax.f32 %v256_v48, 0.0 }
 0x1c1   :  { %v258_v53 = vmax.f32 %v254_v49, 0.0 }
 0x1c2   :  { %v268_v54 = vmax.f32 %v259_v50, %v260_v51 }
 0x1c3   :  { %v261_v55 = vmax.f32 %v257_v52, %v258_v53 }
 0x1c4   :  { %v269_v56 = vrot.slane %v268_v54, 4 }
 0x1c5   :  { %v262_v57 = vrot.slane %v261_v55, 4 }
 0x1c6   :  { %v270_v58 = vmax.f32 %v268_v54, %v269_v56 }
 0x1c7   :  { %v263_v59 = vmax.f32 %v261_v55, %v262_v57 }
 0x1c8   :  { %v271_v60 = vrot.slane %v270_v58, 2 }
 0x1c9   :  { %v264_v61 = vrot.slane %v263_v59, 2 }
 0x1ca   :  { %v272_v62 = vmax.f32 %v270_v58, %v271_v60 }
 0x1cb   :  { %v265_v63 = vmax.f32 %v263_v59, %v264_v61 }
 0x1cc   :  { %v273_v0 = vrot.slane %v272_v62, 1 }
 0x1cd   :  { %v266_v1 = vrot.slane %v265_v63, 1 }
 0x1ce   :  { %v274_v2 = vmax.f32 %v272_v62, %v273_v0 }
 0x1cf   :  { %v267_v3 = vmax.f32 %v265_v63, %v266_v1 }
 0x1d1   :  { %v282_v4 = vsel %vm281_vm2, %v274_v2, %v267_v3 }
 0x1d2   :  { %284 = vst [vmem:[%s464_s7] sm:$0x3] %v282_v4 }

</bundles_post_ra>
